<compile_context>
chip_gen: v6e
topology: v6e:2x2x1
jax: 0.10.0
libtpu: 0.0.40
codegen_flags: <defaults>
</compile_context>

<pallas_src>
import jax
import jax.numpy as jnp
from jax.experimental import pallas as pl
from jax.experimental.pallas import tpu as pltpu

IN_DIM = 28 * 28      # 784
K_PAD = 896           # 7 * 128  (lane-aligned contraction dim)
HIDDEN = 512
OUT_DIM = 10
N_PAD = 128           # lane-dense output width


def mlp_kernel(x_ref, w1_ref, b1_ref, w2_ref, b2_ref, o_ref):
    # x: (TB, K_PAD) bf16, w1: (K_PAD, HIDDEN) bf16, b1: (1, HIDDEN) f32
    # w2: (HIDDEN, N_PAD) bf16, b2: (1, N_PAD) f32, o: (TB, N_PAD) f32
    h = jnp.dot(x_ref[...], w1_ref[...], preferred_element_type=jnp.float32)
    h = jnp.maximum(h + b1_ref[...], 0.0)                       # f32 bias + ReLU
    logits = jnp.dot(h.astype(jnp.bfloat16), w2_ref[...],
                     preferred_element_type=jnp.float32)
    o_ref[...] = (logits + b2_ref[...]).astype(o_ref.dtype)


def prepare_params(w1, b1, w2, b2):
    """One-time repack of the weights for the kernel (hoisted out of the hot path).

    w1: (784, 512) f32, b1: (512,) f32, w2: (512, 10) f32, b2: (10,) f32
    Returns (w1p, b1p, w2p, b2p) already padded / cast for mlp_kernel.
    Zero padding is exact: padded x columns hit zero W1 rows and padded W2
    output columns are sliced off after the kernel.
    """
    w1p = jnp.pad(w1, ((0, K_PAD - IN_DIM), (0, 0))).astype(jnp.bfloat16)
    b1p = b1.reshape(1, HIDDEN).astype(jnp.float32)
    w2p = jnp.pad(w2, ((0, 0), (0, N_PAD - OUT_DIM))).astype(jnp.bfloat16)
    b2p = jnp.pad(b2, (0, N_PAD - OUT_DIM)).reshape(1, N_PAD).astype(jnp.float32)
    return w1p, b1p, w2p, b2p


def neural_network_11(x_nchw, w1p, b1p, w2p, b2p, *, tile_b=512):
    """Forward pass of NeuralNetwork11 (PyTorch semantics, f32 result).

    Takes the *pre-packed* params from prepare_params().
    """
    B = x_nchw.shape[0]

    # Batch tile: multiple of 8 sublanes, capped at tile_b.
    b_pad8 = ((B + 7) // 8) * 8
    tb = max(8, (min(tile_b, b_pad8) // 8) * 8)
    B_pad = ((B + tb - 1) // tb) * tb
    # v7x has 2 TensorCores: make sure a large batch gives the "parallel" grid
    # axis at least 2 steps (no-op cost on single-TC v5e/v6e, ~0.35 us/step).
    if B_pad // tb == 1 and B_pad >= 512:
        tb = max(256, (B_pad // 2 // 256) * 256)
        B_pad = ((B + tb - 1) // tb) * tb

    # nn.Flatten -> (B, 784), cast to bf16 *before* padding so no f32
    # (B_pad, 896) intermediate is materialized; fuse batch + K pads.
    x = x_nchw.reshape(B, -1).astype(jnp.bfloat16)
    xb = jnp.pad(x, ((0, B_pad - B), (0, K_PAD - IN_DIM)))

    weight_bytes = K_PAD * HIDDEN * 2 + HIDDEN * N_PAD * 2 + (HIDDEN + N_PAD) * 4
    flops = 2 * B_pad * (K_PAD * HIDDEN + HIDDEN * N_PAD)
    bytes_accessed = B_pad * K_PAD * 2 + weight_bytes + B_pad * N_PAD * 4

    # VMEM estimate: double-buffered x / out tiles + single-buffered weights.
    vmem_est = (2 * tb * K_PAD * 2 + 2 * tb * N_PAD * 4 + weight_bytes)
    vmem_limit = None
    if vmem_est > 12 * 1024 * 1024:        # approaching v5e's 16 MiB scoped default
        vmem_limit = min(int(vmem_est * 1.5) + (2 << 20), 48 * 1024 * 1024)

    # TODO(synk): serving path (B in the single digits) is ~100% weight-DMA +
    # launch overhead; keep W1/W2 VMEM-resident across calls (cross-pallas_call
    # prefetch, pattern P10) instead of re-streaming ~1.1 MiB per request.
    out = pl.pallas_call(
        mlp_kernel,
        out_shape=jax.ShapeDtypeStruct((B_pad, N_PAD), jnp.float32),
        grid_spec=pltpu.PrefetchScalarGridSpec(
            num_scalar_prefetch=0,
            grid=(B_pad // tb,),
            in_specs=[
                pl.BlockSpec((tb, K_PAD), lambda i: (i, 0)),          # x tile (pipelined)
                pl.BlockSpec((K_PAD, HIDDEN), lambda i: (0, 0),       # W1 resident
                             pipeline_mode=pl.Buffered(1)),
                pl.BlockSpec((1, HIDDEN), lambda i: (0, 0),           # b1 resident
                             pipeline_mode=pl.Buffered(1)),
                pl.BlockSpec((HIDDEN, N_PAD), lambda i: (0, 0),       # W2 resident
                             pipeline_mode=pl.Buffered(1)),
                pl.BlockSpec((1, N_PAD), lambda i: (0, 0),            # b2 resident
                             pipeline_mode=pl.Buffered(1)),
            ],
            out_specs=pl.BlockSpec((tb, N_PAD), lambda i: (i, 0)),
        ),
        compiler_params=pltpu.CompilerParams(
            dimension_semantics=("parallel",),
            vmem_limit_bytes=vmem_limit),
        cost_estimate=pl.CostEstimate(
            flops=flops, transcendentals=0, bytes_accessed=bytes_accessed),
    )(xb, w1p, b1p, w2p, b2p)

    return out[:B, :OUT_DIM]


def init_params(key):
    """Deterministic init mirroring nn.Linear default uniform(-1/sqrt(fan_in), 1/sqrt(fan_in))."""
    k1, k2, k3, k4 = jax.random.split(key, 4)
    bound1 = 1.0 / jnp.sqrt(IN_DIM)
    bound2 = 1.0 / jnp.sqrt(HIDDEN)
    # Stored as (in_features, out_features) so y = x @ W + b matches PyTorch's x @ W_pt.T + b.
    w1 = jax.random.uniform(k1, (IN_DIM, HIDDEN), jnp.float32, -bound1, bound1)
    b1 = jax.random.uniform(k2, (HIDDEN,), jnp.float32, -bound1, bound1)
    w2 = jax.random.uniform(k3, (HIDDEN, OUT_DIM), jnp.float32, -bound2, bound2)
    b2 = jax.random.uniform(k4, (OUT_DIM,), jnp.float32, -bound2, bound2)
    return w1, b1, w2, b2


if __name__ == "__main__":
    key = jax.random.PRNGKey(0)
    k_x, k_p = jax.random.split(key)

    B = 2
    x = jax.random.normal(k_x, (B, 1, 28, 28), jnp.float32)   # NCHW, MNIST-like batch
    w1, b1, w2, b2 = init_params(k_p)

    # One-time weight repack (hoisted out of the per-call path).
    packed = prepare_params(w1, b1, w2, b2)
    packed = jax.block_until_ready(packed)

    logits = neural_network_11(x, *packed)
    jax.block_until_ready(logits)

    # Plain-JAX f32 reference of the same forward pass.
    # Note: kernel uses bf16 matmul inputs (x, W, and the re-cast hidden
    # activations) with f32 accumulation => loose tolerance vs f32 reference.
    x_flat = x.reshape(B, -1)
    ref = jnp.maximum(x_flat @ w1 + b1, 0.0) @ w2 + b2
    assert logits.shape == (B, OUT_DIM)
    assert jnp.allclose(logits, ref, atol=3e-2, rtol=3e-2), (
        float(jnp.max(jnp.abs(logits - ref))))

    print("KERNEL_OK")
</pallas_src>

<mosaic_0001>
module attributes {stable_mosaic.version = 11 : i64} {
  func.func @mlp_kernel(%arg0: i32, %arg1: memref<8x896xbf16, #tpu.memory_space<vmem>>, %arg2: memref<896x512xbf16, #tpu.memory_space<vmem>>, %arg3: memref<1x512xf32, #tpu.memory_space<vmem>>, %arg4: memref<512x128xbf16, #tpu.memory_space<vmem>>, %arg5: memref<1x128xf32, #tpu.memory_space<vmem>>, %arg6: memref<8x128xf32, #tpu.memory_space<vmem>>) attributes {dimension_semantics = [#tpu.dimension_semantics<parallel>], iteration_bounds = array<i64: 1>, scalar_prefetch = 0 : i64, scratch_operands = 0 : i64, tpu.core_type = #tpu.core_type<tc>, window_params = [{transform_indices = @transform_0, window_bounds = array<i64: 8, 896>}, {pipeline_mode = #tpu.pipeline_mode<synchronous>, transform_indices = @transform_1, window_bounds = array<i64: 896, 512>}, {pipeline_mode = #tpu.pipeline_mode<synchronous>, transform_indices = @transform_2, window_bounds = array<i64: 1, 512>}, {pipeline_mode = #tpu.pipeline_mode<synchronous>, transform_indices = @transform_3, window_bounds = array<i64: 512, 128>}, {pipeline_mode = #tpu.pipeline_mode<synchronous>, transform_indices = @transform_4, window_bounds = array<i64: 1, 128>}, {transform_indices = @transform_5, window_bounds = array<i64: 8, 128>}]} {
    %c0 = arith.constant 0 : index
    %c0_0 = arith.constant 0 : index
    %0 = vector.load %arg1[%c0, %c0_0] : memref<8x896xbf16, #tpu.memory_space<vmem>>, vector<8x896xbf16>
    %c0_1 = arith.constant 0 : index
    %c0_2 = arith.constant 0 : index
    %1 = vector.load %arg2[%c0_1, %c0_2] : memref<896x512xbf16, #tpu.memory_space<vmem>>, vector<896x512xbf16>
    %cst = arith.constant dense<0.000000e+00> : vector<8x512xf32>
    %2 = tpu.matmul %0, %1, %cst {dimension_numbers = #tpu.dot_dimension_numbers<[1], [0], [0], [1], [0, 0, 1, 1], [], []>} : vector<8x896xbf16>, vector<896x512xbf16>, vector<8x512xf32> -> vector<8x512xf32>
    %c0_3 = arith.constant 0 : index
    %c0_4 = arith.constant 0 : index
    %3 = vector.load %arg3[%c0_3, %c0_4] : memref<1x512xf32, #tpu.memory_space<vmem>>, vector<1x512xf32>
    %4 = vector.broadcast %3 : vector<1x512xf32> to vector<8x512xf32>
    %5 = arith.addf %2, %4 : vector<8x512xf32>
    %cst_5 = arith.constant 0.000000e+00 : f32
    %6 = vector.broadcast %cst_5 : f32 to vector<8x512xf32>
    %7 = arith.maximumf %5, %6 : vector<8x512xf32>
    %8 = arith.truncf %7 : vector<8x512xf32> to vector<8x512xbf16>
    %c0_6 = arith.constant 0 : index
    %c0_7 = arith.constant 0 : index
    %9 = vector.load %arg4[%c0_6, %c0_7] : memref<512x128xbf16, #tpu.memory_space<vmem>>, vector<512x128xbf16>
    %cst_8 = arith.constant dense<0.000000e+00> : vector<8x128xf32>
    %10 = tpu.matmul %8, %9, %cst_8 {dimension_numbers = #tpu.dot_dimension_numbers<[1], [0], [0], [1], [0, 0, 1, 1], [], []>} : vector<8x512xbf16>, vector<512x128xbf16>, vector<8x128xf32> -> vector<8x128xf32>
    %c0_9 = arith.constant 0 : index
    %c0_10 = arith.constant 0 : index
    %11 = vector.load %arg5[%c0_9, %c0_10] : memref<1x128xf32, #tpu.memory_space<vmem>>, vector<1x128xf32>
    %12 = vector.broadcast %11 : vector<1x128xf32> to vector<8x128xf32>
    %13 = arith.addf %10, %12 : vector<8x128xf32>
    %c0_11 = arith.constant 0 : index
    %c0_12 = arith.constant 0 : index
    %14 = vector.load %arg6[%c0_11, %c0_12] : memref<8x128xf32, #tpu.memory_space<vmem>>, vector<8x128xf32>
    tpu.vector_store %arg6[%c0_11, %c0_12], %13 {strides = array<i32>} : memref<8x128xf32, #tpu.memory_space<vmem>>, vector<8x128xf32>,
    return
  }
  func.func @transform_0(%arg0: i32) -> (i32, i32) {
    %c0_i32 = arith.constant 0 : i32
    %c0_i32_0 = arith.constant 0 : i32
    return %arg0, %c0_i32 : i32, i32
  }
  func.func @transform_1(%arg0: i32) -> (i32, i32) {
    %c0_i32 = arith.constant 0 : i32
    %c0_i32_0 = arith.constant 0 : i32
    %c0_i32_1 = arith.constant 0 : i32
    return %c0_i32, %c0_i32_0 : i32, i32
  }
  func.func @transform_2(%arg0: i32) -> (i32, i32) {
    %c0_i32 = arith.constant 0 : i32
    %c0_i32_0 = arith.constant 0 : i32
    %c0_i32_1 = arith.constant 0 : i32
    return %c0_i32, %c0_i32_0 : i32, i32
  }
  func.func @transform_3(%arg0: i32) -> (i32, i32) {
    %c0_i32 = arith.constant 0 : i32
    %c0_i32_0 = arith.constant 0 : i32
    %c0_i32_1 = arith.constant 0 : i32
    return %c0_i32, %c0_i32_0 : i32, i32
  }
  func.func @transform_4(%arg0: i32) -> (i32, i32) {
    %c0_i32 = arith.constant 0 : i32
    %c0_i32_0 = arith.constant 0 : i32
    %c0_i32_1 = arith.constant 0 : i32
    return %c0_i32, %c0_i32_0 : i32, i32
  }
  func.func @transform_5(%arg0: i32) -> (i32, i32) {
    %c0_i32 = arith.constant 0 : i32
    %c0_i32_0 = arith.constant 0 : i32
    return %arg0, %c0_i32 : i32, i32
  }
}

</mosaic_0001>

<bundles_post_ra>
// kernel: tpu_custom_call.1
= control target key start
LH: loop header
LB: loop body
LE: loop exit
PB: predicated region body
PF: predicated region fallthrough
CT: control target
= control target key end

     0   :  { %10 = vsyncpa [#allocation3], 0  ;;  %s3060_s0 = inlined_call_operand.hbm [shape: bf16[8,896], index: 0, kind: input, shape index: {}]   ;;  %s3061_s1 = inlined_call_operand.hbm [shape: bf16[896,512], index: 1, kind: input, shape index: {}]   ;;  %s3062_s2 = inlined_call_operand.hbm [shape: f32[1,512], index: 2, kind: input, shape index: {}]   ;;  %s3063_s3 = inlined_call_operand.hbm [shape: bf16[512,128], index: 3, kind: input, shape index: {}]   ;;  %s3064_s4 = inlined_call_operand.vmem [shape: f32[1,128], index: 4, kind: input, shape index: {}]   ;;  %s3065_s5 = inlined_call_operand.hbm [shape: f32[8,128], index: 5, kind: output, shape index: {}]  }
   0x1   :  { %11 = vsyncpa [#allocation6], 0 }
   0x2   :  { %12 = vsyncpa [#allocation9], 0 }
   0x3   :  { %13 = vsyncpa [#allocation4], 0  ;;  %s2966_s18 = smov [#allocation5]  }
   0x4   :  { %s29_s19 = sshll.u32 %s2966_s18, 4  ;;  %s30_s19 = int_to_ptr.vmem [resolvable:$true] %s29_s19 }
   0x5   :  { %s2866_s20 = scalar_lea.vmem %s30_s19, 28672  ;;  %p2871_p1 = scmp.lt.s32.totalorder %s30_s19, %s30_s19 }
   0x6   :  { %p2867_p0 = scmp.ne.s32.totalorder %s30_s19, %s2866_s20  ;;  %p2872_p2 = scmp.lt.s32.totalorder %s2866_s20, %s2866_s20 }
   0x8   :  { %p2873_p3 = por %p2872_p2, %p2871_p1 }
   0xa   :  { %p2874_p4 = pnand %p2873_p3, %p2867_p0 }
   0xc   :  { %2877 = shalt.err (!%p2874_p4)
}
   0xd   :  { %s2967_s21 = smov 256   ;;  %s2968_s22 = smov 16  }
   0xe   :  { %35 = dma.hbm_to_vmem [thread:$0]  %s3061_s1, 28672, %s30_s19, [#allocation6], %s2967_s21, %s2967_s21, %s2968_s22  }
   0xf   :  { %s2969_s25 = smov [#allocation2]   ;;  %s2970_s27 = smov [#allocation7]  }
  0x10   :  { %s20_s26 = sshll.u32 %s2969_s25, 4  ;;  %s42_s28 = sshll.u32 %s2970_s27, 4  ;;  %s21_s26 = int_to_ptr.vmem [resolvable:$true] %s20_s26  ;;  %s43_s28 = int_to_ptr.vmem [resolvable:$true] %s42_s28 }
  0x11   :  { %s2886_s29 = scalar_lea.vmem %s21_s26, 448  ;;  %p2891_p6 = scmp.lt.s32.totalorder %s21_s26, %s21_s26 }
  0x12   :  { %p2887_p5 = scmp.ne.s32.totalorder %s21_s26, %s2886_s29  ;;  %p2892_p7 = scmp.lt.s32.totalorder %s2886_s29, %s2886_s29 }
  0x14   :  { %p2893_p8 = por %p2892_p7, %p2891_p6 }
  0x16   :  { %p2894_p9 = pnand %p2893_p8, %p2887_p5 }
  0x18   :  { %2897 = shalt.err (!%p2894_p9)
}
  0x19   :  { %23 = dma.hbm_to_vmem [thread:$0]  %s3060_s0, 448, %s21_s26, [#allocation3]  }
  0x1a   :  { %s2906_s7 = scalar_lea.vmem %s43_s28, 64  ;;  %p2911_p11 = scmp.lt.s32.totalorder %s43_s28, %s43_s28 }
  0x1b   :  { %p2907_p10 = scmp.ne.s32.totalorder %s43_s28, %s2906_s7  ;;  %p2912_p12 = scmp.lt.s32.totalorder %s2906_s7, %s2906_s7 }
  0x1d   :  { %p2913_p13 = por %p2912_p12, %p2911_p11 }
  0x1f   :  { %p2914_p0 = pnand %p2913_p13, %p2907_p10 }
  0x21   :  { %2917 = shalt.err (!%p2914_p0)
}
  0x22   :  { %45 = dma.hbm_to_vmem [thread:$0]  %s3062_s2, 64, %s43_s28, [#allocation6]  }
  0x23   :  { %s2971_s9 = smov [#allocation8]  }
  0x24   :  { %s51_s10 = sshll.u32 %s2971_s9, 4  ;;  %s52_s10 = int_to_ptr.vmem [resolvable:$true] %s51_s10 }
  0x25   :  { %s2926_s11 = scalar_lea.vmem %s52_s10, 4096  ;;  %p2931_p2 = scmp.lt.s32.totalorder %s52_s10, %s52_s10 }
  0x26   :  { %p2927_p1 = scmp.ne.s32.totalorder %s52_s10, %s2926_s11  ;;  %p2932_p3 = scmp.lt.s32.totalorder %s2926_s11, %s2926_s11 }
  0x28   :  { %p2933_p4 = por %p2932_p3, %p2931_p2 }
  0x2a   :  { %p2934_p5 = pnand %p2933_p4, %p2927_p1 }
  0x2c   :  { %2937 = shalt.err (!%p2934_p5)
}
  0x2d   :  { %s2972_s0 = smov 64   ;;  %s2973_s12 = smov 4  }
  0x2e   :  { %57 = dma.hbm_to_vmem [thread:$0]  %s3063_s3, 4096, %s52_s10, [#allocation9], %s2972_s0, %s2972_s0, %s2973_s12  }
  0x2f   :  { %2958 = dma.done.wait [#allocation3], 448  }
  0x30   :  { %2959 = vsyncadd [#allocation3], 4294966848 }
  0x31   :  { %2960 = dma.done.wait [#allocation6], 28736  }
  0x32   :  { %2961 = vsyncadd [#allocation6], 4294938560 }
  0x33   :  { %2962 = dma.done.wait [#allocation9], 4096  }
  0x34   :  { %2963 = vsyncadd [#allocation9], 4294963200  ;;  %v2483_v0 = vld [vmem:[#allocation5 + $0xe4] ss:$16 sps:$4 sm:$0xff]   ;;  %v2487_v2 = vld [vmem:[#allocation5 + $0xe0] ss:$16 sps:$4 sm:$0xff]  }
  0x35   :  { %v2485_v1 = vld [vmem:[#allocation5 + $0x2e4] ss:$16 sps:$4 sm:$0xff]   ;;  %1468 = vmatprep.subr.bf16.mxu0 %v2483_v0  ;;  %v2488_v3 = vld [vmem:[#allocation5 + $0x2e0] ss:$16 sps:$4 sm:$0xff]   ;;  %s2975_s15 = smov [#allocation10]  }
  0x36   :  { %1509 = vmatprep.subr.bf16.mxu1 %v2485_v1  ;;  %v2489_v4 = vld [vmem:[#allocation5 + $0xc4] ss:$16 sps:$4 sm:$0xff]   ;;  %1469 = vmatpush1.bf16.msra.mxu0 %v2487_v2  ;;  %v2493_v6 = vld [vmem:[#allocation5 + $0xc0] ss:$16 sps:$4 sm:$0xff]   ;;  %s2154_s16 = sshll.u32 %s2975_s15, 4  ;;  %s2155_s16 = int_to_ptr.vmem [resolvable:$true] %s2154_s16 }
  0x37   :  { %1510 = vmatpush1.bf16.msra.mxu1 %v2488_v3  ;;  %v2491_v5 = vld [vmem:[#allocation5 + $0x2c4] ss:$16 sps:$4 sm:$0xff]   ;;  %1470 = vmatprep.subr.bf16.mxu0 %v2489_v4  ;;  %v2494_v7 = vld [vmem:[#allocation5 + $0x2c0] ss:$16 sps:$4 sm:$0xff]   ;;  %s2938_s17 = scalar_lea.vmem %s2155_s16, 128  ;;  %p2943_p7 = scmp.lt.s32.totalorder %s2155_s16, %s2155_s16 }
  0x38   :  { %1511 = vmatprep.subr.bf16.mxu1 %v2491_v5  ;;  %v2495_v8 = vld [vmem:[#allocation5 + $0xa4] ss:$16 sps:$4 sm:$0xff]   ;;  %v2499_v10 = vld [vmem:[#allocation5 + $0xa0] ss:$16 sps:$4 sm:$0xff]   ;;  %p2939_p6 = scmp.ne.s32.totalorder %s2155_s16, %s2938_s17  ;;  %p2944_p8 = scmp.lt.s32.totalorder %s2938_s17, %s2938_s17 }
  0x39   :  { %v2497_v9 = vld [vmem:[#allocation5 + $0x2a4] ss:$16 sps:$4 sm:$0xff]   ;;  %v2500_v11 = vld [vmem:[#allocation5 + $0x2a0] ss:$16 sps:$4 sm:$0xff]  }
  0x3a   :  { %1471 = vmatpush1.bf16.msra.mxu0 %v2493_v6  ;;  %v2501_v12 = vld [vmem:[#allocation5 + $0x84] ss:$16 sps:$4 sm:$0xff]   ;;  %v2505_v14 = vld [vmem:[#allocation5 + $0x80] ss:$16 sps:$4 sm:$0xff]   ;;  %p2945_p9 = por %p2944_p8, %p2943_p7 }
  0x3b   :  { %1512 = vmatpush1.bf16.msra.mxu1 %v2494_v7  ;;  %1472 = vmatprep.subr.bf16.mxu0 %v2495_v8  ;;  %v2503_v13 = vld [vmem:[#allocation5 + $0x284] ss:$16 sps:$4 sm:$0xff]   ;;  %v2506_v15 = vld [vmem:[#allocation5 + $0x280] ss:$16 sps:$4 sm:$0xff]  }
  0x3c   :  { %1513 = vmatprep.subr.bf16.mxu1 %v2497_v9  ;;  %v2507_v16 = vld [vmem:[#allocation5 + $0x64] ss:$16 sps:$4 sm:$0xff]   ;;  %v2511_v18 = vld [vmem:[#allocation5 + $0x60] ss:$16 sps:$4 sm:$0xff]   ;;  %p2946_p10 = pnand %p2945_p9, %p2939_p6 }
  0x3d   :  { %v2509_v17 = vld [vmem:[#allocation5 + $0x264] ss:$16 sps:$4 sm:$0xff]   ;;  %v2512_v19 = vld [vmem:[#allocation5 + $0x260] ss:$16 sps:$4 sm:$0xff]  }
  0x3e   :  { %1473 = vmatpush1.bf16.msra.mxu0 %v2499_v10  ;;  %v2513_v20 = vld [vmem:[#allocation5 + $0x44] ss:$16 sps:$4 sm:$0xff]   ;;  %v2517_v22 = vld [vmem:[#allocation5 + $0x40] ss:$16 sps:$4 sm:$0xff]  }
  0x3f   :  { %1514 = vmatpush1.bf16.msra.mxu1 %v2500_v11  ;;  %1474 = vmatprep.subr.bf16.mxu0 %v2501_v12  ;;  %v2515_v21 = vld [vmem:[#allocation5 + $0x244] ss:$16 sps:$4 sm:$0xff]   ;;  %v2518_v23 = vld [vmem:[#allocation5 + $0x240] ss:$16 sps:$4 sm:$0xff]  }
  0x40   :  { %1515 = vmatprep.subr.bf16.mxu1 %v2503_v13  ;;  %v2519_v24 = vld [vmem:[#allocation5 + $0x24] ss:$16 sps:$4 sm:$0xff]   ;;  %v2523_v26 = vld [vmem:[#allocation5 + $0x20] ss:$16 sps:$4 sm:$0xff]  }
  0x41   :  { %v2521_v25 = vld [vmem:[#allocation5 + $0x224] ss:$16 sps:$4 sm:$0xff]   ;;  %v2524_v27 = vld [vmem:[#allocation5 + $0x220] ss:$16 sps:$4 sm:$0xff]  }
  0x42   :  { %1475 = vmatpush1.bf16.msra.mxu0 %v2505_v14  ;;  %v2525_v28 = vld [vmem:[#allocation5 + $0x4] ss:$16 sps:$4 sm:$0xff]   ;;  %v2529_v30 = vld [vmem:[#allocation5] ss:$16 sps:$4 sm:$0xff]  }
  0x43   :  { %1516 = vmatpush1.bf16.msra.mxu1 %v2506_v15  ;;  %1476 = vmatprep.subr.bf16.mxu0 %v2507_v16  ;;  %v2527_v29 = vld [vmem:[#allocation5 + $0x204] ss:$16 sps:$4 sm:$0xff]   ;;  %v2530_v31 = vld [vmem:[#allocation5 + $0x200] ss:$16 sps:$4 sm:$0xff]   ;;  %v2974_v16 = vmov 0  }
  0x44   :  { %1517 = vmatprep.subr.bf16.mxu1 %v2509_v17  ;;  %v2531_v32 = vld [vmem:[#allocation5 + $0x1e4] ss:$16 sps:$4 sm:$0xff]   ;;  %v2535_v34 = vld [vmem:[#allocation5 + $0x1e0] ss:$16 sps:$4 sm:$0xff]  }
  0x45   :  { %v2533_v33 = vld [vmem:[#allocation5 + $0x3e4] ss:$16 sps:$4 sm:$0xff]   ;;  %v2536_v35 = vld [vmem:[#allocation5 + $0x3e0] ss:$16 sps:$4 sm:$0xff]  }
  0x46   :  { %1477 = vmatpush1.bf16.msra.mxu0 %v2511_v18  ;;  %v2537_v36 = vld [vmem:[#allocation5 + $0x1c4] ss:$16 sps:$4 sm:$0xff]   ;;  %v2541_v38 = vld [vmem:[#allocation5 + $0x1c0] ss:$16 sps:$4 sm:$0xff]  }
  0x47   :  { %1518 = vmatpush1.bf16.msra.mxu1 %v2512_v19  ;;  %1478 = vmatprep.subr.bf16.mxu0 %v2513_v20  ;;  %v2539_v37 = vld [vmem:[#allocation5 + $0x3c4] ss:$16 sps:$4 sm:$0xff]   ;;  %v2542_v39 = vld [vmem:[#allocation5 + $0x3c0] ss:$16 sps:$4 sm:$0xff]  }
  0x48   :  { %1519 = vmatprep.subr.bf16.mxu1 %v2515_v21  ;;  %v2543_v40 = vld [vmem:[#allocation5 + $0x1a4] ss:$16 sps:$4 sm:$0xff]   ;;  %v2547_v42 = vld [vmem:[#allocation5 + $0x1a0] ss:$16 sps:$4 sm:$0xff]  }
  0x49   :  { %v2545_v41 = vld [vmem:[#allocation5 + $0x3a4] ss:$16 sps:$4 sm:$0xff]   ;;  %v2548_v43 = vld [vmem:[#allocation5 + $0x3a0] ss:$16 sps:$4 sm:$0xff]  }
  0x4a   :  { %1479 = vmatpush1.bf16.msra.mxu0 %v2517_v22  ;;  %v2549_v44 = vld [vmem:[#allocation5 + $0x184] ss:$16 sps:$4 sm:$0xff]   ;;  %v74_v48 = vld [vmem:[#allocation2 + $0x8] sm:$0xff] }
  0x4b   :  { %1520 = vmatpush1.bf16.msra.mxu1 %v2518_v23  ;;  %1480 = vmatprep.subr.bf16.mxu0 %v2519_v24  ;;  %v2551_v45 = vld [vmem:[#allocation5 + $0x384] ss:$16 sps:$4 sm:$0xff]   ;;  %v2553_v49 = vld [vmem:[#allocation5 + $0x180] ss:$16 sps:$4 sm:$0xff]   ;;  %v3020_v51 = vcombine.high %v74_v48, %v74_v48  ;;  %v3026_v7 = vcombine.low %v74_v48, %v74_v48  ;;  %v2643_v48 = vld [vmem:[#allocation5 + $0xcc] ss:$16 sps:$4 sm:$0xff]  }
  0x4c   :  { %1521 = vmatprep.subr.bf16.mxu1 %v2521_v25  ;;  %v73_v46 = vld [vmem:[#allocation2] sm:$0xff]  ;;  %v2554_v50 = vld [vmem:[#allocation5 + $0x380] ss:$16 sps:$4 sm:$0xff]  }
  0x4d   :  { %v3018_v47 = vcombine.high %v73_v46, %v73_v46  ;;  %v2555_v52 = vld [vmem:[#allocation5 + $0x164] ss:$16 sps:$4 sm:$0xff]   ;;  %1541 = vmatprep.mubr.bf16.mxu1 %v3020_v51  ;;  %v2559_v54 = vld [vmem:[#allocation5 + $0x160] ss:$16 sps:$4 sm:$0xff]   ;;  %v3024_v6 = vcombine.low %v73_v46, %v73_v46 }
  0x4e   :  { %1481 = vmatpush1.bf16.msra.mxu0 %v2523_v26  ;;  %v2557_v53 = vld [vmem:[#allocation5 + $0x364] ss:$16 sps:$4 sm:$0xff]   ;;  %v2560_v55 = vld [vmem:[#allocation5 + $0x360] ss:$16 sps:$4 sm:$0xff]  }
  0x4f   :  { %1522 = vmatpush1.bf16.msra.mxu1 %v2524_v27  ;;  %1482 = vmatprep.subr.bf16.mxu0 %v2525_v28  ;;  %v2561_v56 = vld [vmem:[#allocation5 + $0x144] ss:$16 sps:$4 sm:$0xff]   ;;  %v2565_v58 = vld [vmem:[#allocation5 + $0x140] ss:$16 sps:$4 sm:$0xff]  }
  0x50   :  { %1523 = vmatprep.subr.bf16.mxu1 %v2527_v29  ;;  %1500 = vmatprep.mubr.bf16.mxu0 %v3018_v47  ;;  %v2563_v57 = vld [vmem:[#allocation5 + $0x344] ss:$16 sps:$4 sm:$0xff]   ;;  %v2566_v59 = vld [vmem:[#allocation5 + $0x340] ss:$16 sps:$4 sm:$0xff]  }
  0x51   :  { %v2567_v60 = vld [vmem:[#allocation5 + $0x124] ss:$16 sps:$4 sm:$0xff]   ;;  %v2571_v62 = vld [vmem:[#allocation5 + $0x120] ss:$16 sps:$4 sm:$0xff]  }
  0x52   :  { %1483 = vmatpush1.bf16.msra.mxu0 %v2529_v30  ;;  %v2569_v61 = vld [vmem:[#allocation5 + $0x324] ss:$16 sps:$4 sm:$0xff]   ;;  %v2572_v63 = vld [vmem:[#allocation5 + $0x320] ss:$16 sps:$4 sm:$0xff]  }
  0x53   :  { %1524 = vmatpush1.bf16.msra.mxu1 %v2530_v31  ;;  %1484 = vmatprep.subr.bf16.mxu0 %v2531_v32  ;;  %v2573_v0 = vld [vmem:[#allocation5 + $0x104] ss:$16 sps:$4 sm:$0xff]   ;;  %v2577_v2 = vld [vmem:[#allocation5 + $0x100] ss:$16 sps:$4 sm:$0xff]  }
  0x54   :  { %1525 = vmatprep.subr.bf16.mxu1 %v2533_v33  ;;  %v2575_v1 = vld [vmem:[#allocation5 + $0x304] ss:$16 sps:$4 sm:$0xff]   ;;  %v2578_v3 = vld [vmem:[#allocation5 + $0x300] ss:$16 sps:$4 sm:$0xff]  }
  0x55   :  { %v2585_v4 = vld [vmem:[#allocation5 + $0x4e4] ss:$16 sps:$4 sm:$0xff]   ;;  %v2583_v8 = vld [vmem:[#allocation5 + $0x4e0] ss:$16 sps:$4 sm:$0xff]  }
  0x56   :  { %1485 = vmatpush2.bf16.msra.mxu0 %v2535_v34  ;;  %v2588_v5 = vld [vmem:[#allocation5 + $0x6e4] ss:$16 sps:$4 sm:$0xff]   ;;  %v2586_v9 = vld [vmem:[#allocation5 + $0x6e0] ss:$16 sps:$4 sm:$0xff]  }
  0x57   :  { %1526 = vmatpush2.bf16.msra.mxu1 %v2536_v35  ;;  %1486 = vmatprep.subr.bf16.mxu0 %v2537_v36  ;;  %v2591_v10 = vld [vmem:[#allocation5 + $0x4c4] ss:$16 sps:$4 sm:$0xff]   ;;  %v2589_v12 = vld [vmem:[#allocation5 + $0x4c0] ss:$16 sps:$4 sm:$0xff]  }
  0x58   :  { %1527 = vmatprep.subr.bf16.mxu1 %v2539_v37  ;;  %v2594_v11 = vld [vmem:[#allocation5 + $0x6c4] ss:$16 sps:$4 sm:$0xff]   ;;  %v2592_v13 = vld [vmem:[#allocation5 + $0x6c0] ss:$16 sps:$4 sm:$0xff]  }
  0x59   :  { %v2597_v14 = vld [vmem:[#allocation5 + $0x4a4] ss:$16 sps:$4 sm:$0xff]   ;;  %v2595_v17 = vld [vmem:[#allocation5 + $0x4a0] ss:$16 sps:$4 sm:$0xff]  }
  0x5a   :  { %1487 = vmatpush2.bf16.msra.mxu0 %v2541_v38  ;;  %v2600_v15 = vld [vmem:[#allocation5 + $0x6a4] ss:$16 sps:$4 sm:$0xff]   ;;  %v2598_v18 = vld [vmem:[#allocation5 + $0x6a0] ss:$16 sps:$4 sm:$0xff]  }
  0x5b   :  { %1528 = vmatpush2.bf16.msra.mxu1 %v2542_v39  ;;  %1488 = vmatprep.subr.bf16.mxu0 %v2543_v40  ;;  %v2603_v19 = vld [vmem:[#allocation5 + $0x484] ss:$16 sps:$4 sm:$0xff]   ;;  %v2601_v21 = vld [vmem:[#allocation5 + $0x480] ss:$16 sps:$4 sm:$0xff]  }
  0x5c   :  { %1529 = vmatprep.subr.bf16.mxu1 %v2545_v41  ;;  %v2606_v20 = vld [vmem:[#allocation5 + $0x684] ss:$16 sps:$4 sm:$0xff]   ;;  %v2604_v22 = vld [vmem:[#allocation5 + $0x680] ss:$16 sps:$4 sm:$0xff]  }
  0x5d   :  { %v2609_v23 = vld [vmem:[#allocation5 + $0x464] ss:$16 sps:$4 sm:$0xff]   ;;  %v2607_v25 = vld [vmem:[#allocation5 + $0x460] ss:$16 sps:$4 sm:$0xff]  }
  0x5e   :  { %1489 = vmatpush2.bf16.msra.mxu0 %v2547_v42  ;;  %v2612_v24 = vld [vmem:[#allocation5 + $0x664] ss:$16 sps:$4 sm:$0xff]   ;;  %v2610_v26 = vld [vmem:[#allocation5 + $0x660] ss:$16 sps:$4 sm:$0xff]   ;;  %v2637_v42 = vld [vmem:[#allocation5 + $0xec] ss:$16 sps:$4 sm:$0xff]  }
  0x5f   :  { %1530 = vmatpush2.bf16.msra.mxu1 %v2548_v43  ;;  %1490 = vmatprep.subr.bf16.mxu0 %v2549_v44  ;;  %v2615_v27 = vld [vmem:[#allocation5 + $0x444] ss:$16 sps:$4 sm:$0xff]   ;;  %v2613_v29 = vld [vmem:[#allocation5 + $0x440] ss:$16 sps:$4 sm:$0xff]   ;;  %v3038_v44 = vld [vmem:[#allocation2 + $0x18] ss:$0 sps:$4 sm:$0xff]  }
  0x60   :  { %1531 = vmatprep.subr.bf16.mxu1 %v2551_v45  ;;  %v2618_v28 = vld [vmem:[#allocation5 + $0x644] ss:$16 sps:$4 sm:$0xff]   ;;  %v2616_v30 = vld [vmem:[#allocation5 + $0x640] ss:$16 sps:$4 sm:$0xff]   ;;  %v2635_v45 = vld [vmem:[#allocation5 + $0xe8] ss:$16 sps:$4 sm:$0xff]  }
  0x61   :  { %v2621_v31 = vld [vmem:[#allocation5 + $0x424] ss:$16 sps:$4 sm:$0xff]   ;;  %v2619_v34 = vld [vmem:[#allocation5 + $0x420] ss:$16 sps:$4 sm:$0xff]  }
  0x62   :  { %1491 = vmatpush2.bf16.msra.mxu0 %v2553_v49  ;;  %v2624_v32 = vld [vmem:[#allocation5 + $0x624] ss:$16 sps:$4 sm:$0xff]   ;;  %v2622_v36 = vld [vmem:[#allocation5 + $0x620] ss:$16 sps:$4 sm:$0xff]  }
  0x63   :  { %1532 = vmatpush2.bf16.msra.mxu1 %v2554_v50  ;;  %1492 = vmatprep.subr.bf16.mxu0 %v2555_v52  ;;  %v3031_v33 = vld [vmem:[#allocation2 + $0x10] sm:$0xff]  ;;  %v2625_v39 = vld [vmem:[#allocation5 + $0x400] ss:$16 sps:$4 sm:$0xff]  }
  0x64   :  { %1533 = vmatprep.subr.bf16.mxu1 %v2557_v53  ;;  %v3035_v35 = vcombine.high %v3031_v33, %v3031_v33  ;;  %v2627_v37 = vld [vmem:[#allocation5 + $0x404] ss:$16 sps:$4 sm:$0xff]   ;;  %v2628_v40 = vld [vmem:[#allocation5 + $0x600] ss:$16 sps:$4 sm:$0xff]   ;;  %v2641_v50 = vld [vmem:[#allocation5 + $0xc8] ss:$16 sps:$4 sm:$0xff]  }
  0x65   :  { %v2630_v38 = vld [vmem:[#allocation5 + $0x604] ss:$16 sps:$4 sm:$0xff]   ;;  %v2631_v43 = vld [vmem:[#allocation5 + $0x5e0] ss:$16 sps:$4 sm:$0xff]   ;;  %v2649_v53 = vld [vmem:[#allocation5 + $0xac] ss:$16 sps:$4 sm:$0xff]  }
  0x66   :  { %1493 = vmatpush2.bf16.msra.mxu0 %v2559_v54  ;;  %v2633_v41 = vld [vmem:[#allocation5 + $0x5e4] ss:$16 sps:$4 sm:$0xff]   ;;  %v2638_v49 = vld [vmem:[#allocation5 + $0x5c0] ss:$16 sps:$4 sm:$0xff]  }
  0x67   :  { %1534 = vmatpush2.bf16.msra.mxu1 %v2560_v55  ;;  %1494 = vmatprep.subr.bf16.mxu0 %v2561_v56  ;;  %v2640_v46 = vld [vmem:[#allocation5 + $0x5c4] ss:$16 sps:$4 sm:$0xff]   ;;  %v2644_v54 = vld [vmem:[#allocation5 + $0x5a0] ss:$16 sps:$4 sm:$0xff]   ;;  %v2647_v55 = vld [vmem:[#allocation5 + $0xa8] ss:$16 sps:$4 sm:$0xff]  }
  0x68   :  { %1535 = vmatprep.subr.bf16.mxu1 %v2563_v57  ;;  %v2646_v52 = vld [vmem:[#allocation5 + $0x5a4] ss:$16 sps:$4 sm:$0xff]   ;;  %v2655_v57 = vld [vmem:[#allocation5 + $0x8c] ss:$16 sps:$4 sm:$0xff]  }
  0x69   :  { %v2652_v56 = vld [vmem:[#allocation5 + $0x584] ss:$16 sps:$4 sm:$0xff]  }
  0x6a   :  { %1495 = vmatpush2.bf16.msra.mxu0 %v2565_v58  ;;  %v2650_v58 = vld [vmem:[#allocation5 + $0x580] ss:$16 sps:$4 sm:$0xff]  }
  0x6b   :  { %1536 = vmatpush2.bf16.msra.mxu1 %v2566_v59  ;;  %1496 = vmatprep.subr.bf16.mxu0 %v2567_v60  ;;  %v2653_v59 = vld [vmem:[#allocation5 + $0x88] ss:$16 sps:$4 sm:$0xff]   ;;  %v2658_v60 = vld [vmem:[#allocation5 + $0x564] ss:$16 sps:$4 sm:$0xff]  }
  0x6c   :  { %1537 = vmatprep.subr.bf16.mxu1 %v2569_v61  ;;  %v2661_v61 = vld [vmem:[#allocation5 + $0x6c] ss:$16 sps:$4 sm:$0xff]  }
  0x6e   :  { %1497 = vmatpush2.bf16.msra.mxu0 %v2571_v62  ;;  %v2656_v62 = vld [vmem:[#allocation5 + $0x560] ss:$16 sps:$4 sm:$0xff]  }
  0x6f   :  { %1538 = vmatpush2.bf16.msra.mxu1 %v2572_v63  ;;  %1498 = vmatprep.subr.bf16.mxu0 %v2573_v0  ;;  %v2664_v63 = vld [vmem:[#allocation5 + $0x544] ss:$16 sps:$4 sm:$0xff]   ;;  %v2667_v0 = vld [vmem:[#allocation5 + $0x4c] ss:$16 sps:$4 sm:$0xff]  }
  0x70   :  { %1539 = vmatprep.subr.bf16.mxu1 %v2575_v1  ;;  %v2662_v1 = vld [vmem:[#allocation5 + $0x540] ss:$16 sps:$4 sm:$0xff]  }
  0x72   :  { %1499 = vmatpush2.bf16.msra.mxu0 %v2577_v2  ;;  %v2665_v2 = vld [vmem:[#allocation5 + $0x48] ss:$16 sps:$4 sm:$0xff]  }
  0x73   :  { %1540 = vmatpush2.bf16.msra.mxu1 %v2578_v3  ;;  %1550 = vmatprep.subr.bf16.mxu0 %v2585_v4  ;;  %v2670_v3 = vld [vmem:[#allocation5 + $0x524] ss:$16 sps:$4 sm:$0xff]   ;;  %v2673_v4 = vld [vmem:[#allocation5 + $0x2c] ss:$16 sps:$4 sm:$0xff]  }
  0x74   :  { %1591 = vmatprep.subr.bf16.mxu1 %v2588_v5  ;;  %v2668_v5 = vld [vmem:[#allocation5 + $0x520] ss:$16 sps:$4 sm:$0xff]  }
  0x75   :  { %1501 = vmatmul.mubr.bf16.vlgmr.msra.gmra.mxu0 %v3024_v6 }
  0x76   :  { %1542 = vmatmul.mubr.bf16.vlgmr.msra.gmra.mxu1 %v3026_v7  ;;  %1551 = vmatpush1.bf16.msra.mxu0 %v2583_v8  ;;  %v2671_v8 = vld [vmem:[#allocation5 + $0x28] ss:$16 sps:$4 sm:$0xff]  }
  0x77   :  { %1592 = vmatpush1.bf16.msra.mxu1 %v2586_v9  ;;  %1552 = vmatprep.subr.bf16.mxu0 %v2591_v10  ;;  %v2676_v9 = vld [vmem:[#allocation5 + $0x504] ss:$16 sps:$4 sm:$0xff]   ;;  %v2679_v10 = vld [vmem:[#allocation5 + $0xc] ss:$16 sps:$4 sm:$0xff]  }
  0x78   :  { %1593 = vmatprep.subr.bf16.mxu1 %v2594_v11  ;;  %1623 = vmatprep.mubr.bf16.mxu1 %v2974_v16  ;;  %v2674_v11 = vld [vmem:[#allocation5 + $0x500] ss:$16 sps:$4 sm:$0xff]  }
  0x79   :  { %1582 = vmatprep.mubr.bf16.mxu0 %v3035_v35 }
  0x7a   :  { %1553 = vmatpush1.bf16.msra.mxu0 %v2589_v12  ;;  %v2677_v12 = vld [vmem:[#allocation5 + $0x8] ss:$16 sps:$4 sm:$0xff]  }
  0x7b   :  { %1594 = vmatpush1.bf16.msra.mxu1 %v2592_v13  ;;  %1554 = vmatprep.subr.bf16.mxu0 %v2597_v14  ;;  %v2684_v13 = vld [vmem:[#allocation5 + $0x1ec] ss:$16 sps:$4 sm:$0xff]  }
  0x7c   :  { %1595 = vmatprep.subr.bf16.mxu1 %v2600_v15  ;;  %v2687_v14 = vld [vmem:[#allocation5 + $0x2ec] ss:$16 sps:$4 sm:$0xff]   ;;  %v3044_v15 = vcombine.low %v3031_v33, %v3031_v33  ;;  %v2706_v33 = vld [vmem:[#allocation5 + $0x168] ss:$16 sps:$4 sm:$0xff]  }
  0x7e   :  { %1555 = vmatpush1.bf16.msra.mxu0 %v2595_v17  ;;  %v2682_v17 = vld [vmem:[#allocation5 + $0x1e8] ss:$16 sps:$4 sm:$0xff]  }
  0x7f   :  { %1596 = vmatpush1.bf16.msra.mxu1 %v2598_v18  ;;  %1556 = vmatprep.subr.bf16.mxu0 %v2603_v19  ;;  %v2685_v18 = vld [vmem:[#allocation5 + $0x2e8] ss:$16 sps:$4 sm:$0xff]   ;;  %v2690_v19 = vld [vmem:[#allocation5 + $0x1cc] ss:$16 sps:$4 sm:$0xff]  }
  0x80   :  { %1597 = vmatprep.subr.bf16.mxu1 %v2606_v20  ;;  %v2693_v20 = vld [vmem:[#allocation5 + $0x2cc] ss:$16 sps:$4 sm:$0xff]  }
  0x82   :  { %1557 = vmatpush1.bf16.msra.mxu0 %v2601_v21  ;;  %v2688_v21 = vld [vmem:[#allocation5 + $0x1c8] ss:$16 sps:$4 sm:$0xff]  }
  0x83   :  { %1598 = vmatpush1.bf16.msra.mxu1 %v2604_v22  ;;  %1558 = vmatprep.subr.bf16.mxu0 %v2609_v23  ;;  %v2691_v22 = vld [vmem:[#allocation5 + $0x2c8] ss:$16 sps:$4 sm:$0xff]   ;;  %v2696_v23 = vld [vmem:[#allocation5 + $0x1ac] ss:$16 sps:$4 sm:$0xff]  }
  0x84   :  { %1599 = vmatprep.subr.bf16.mxu1 %v2612_v24  ;;  %v2699_v24 = vld [vmem:[#allocation5 + $0x2ac] ss:$16 sps:$4 sm:$0xff]  }
  0x86   :  { %1559 = vmatpush1.bf16.msra.mxu0 %v2607_v25  ;;  %v2694_v25 = vld [vmem:[#allocation5 + $0x1a8] ss:$16 sps:$4 sm:$0xff]  }
  0x87   :  { %1600 = vmatpush1.bf16.msra.mxu1 %v2610_v26  ;;  %1560 = vmatprep.subr.bf16.mxu0 %v2615_v27  ;;  %v2697_v26 = vld [vmem:[#allocation5 + $0x2a8] ss:$16 sps:$4 sm:$0xff]   ;;  %v2702_v27 = vld [vmem:[#allocation5 + $0x18c] ss:$16 sps:$4 sm:$0xff]  }
  0x88   :  { %1601 = vmatprep.subr.bf16.mxu1 %v2618_v28  ;;  %v2705_v28 = vld [vmem:[#allocation5 + $0x28c] ss:$16 sps:$4 sm:$0xff]  }
  0x8a   :  { %1561 = vmatpush1.bf16.msra.mxu0 %v2613_v29  ;;  %v2700_v29 = vld [vmem:[#allocation5 + $0x188] ss:$16 sps:$4 sm:$0xff]  }
  0x8b   :  { %1602 = vmatpush1.bf16.msra.mxu1 %v2616_v30  ;;  %1562 = vmatprep.subr.bf16.mxu0 %v2621_v31  ;;  %v2703_v30 = vld [vmem:[#allocation5 + $0x288] ss:$16 sps:$4 sm:$0xff]   ;;  %v2708_v31 = vld [vmem:[#allocation5 + $0x16c] ss:$16 sps:$4 sm:$0xff]  }
  0x8c   :  { %1603 = vmatprep.subr.bf16.mxu1 %v2624_v32  ;;  %v2711_v32 = vld [vmem:[#allocation5 + $0x26c] ss:$16 sps:$4 sm:$0xff]  }
  0x8e   :  { %1563 = vmatpush1.bf16.msra.mxu0 %v2619_v34  ;;  %v2714_v34 = vld [vmem:[#allocation5 + $0x14c] ss:$16 sps:$4 sm:$0xff]  }
  0x8f   :  { %1604 = vmatpush1.bf16.msra.mxu1 %v2622_v36  ;;  %1564 = vmatprep.subr.bf16.mxu0 %v2627_v37  ;;  %v2717_v36 = vld [vmem:[#allocation5 + $0x24c] ss:$16 sps:$4 sm:$0xff]   ;;  %v2712_v37 = vld [vmem:[#allocation5 + $0x148] ss:$16 sps:$4 sm:$0xff]  }
  0x90   :  { %1605 = vmatprep.subr.bf16.mxu1 %v2630_v38  ;;  %v2715_v38 = vld [vmem:[#allocation5 + $0x248] ss:$16 sps:$4 sm:$0xff]  }
  0x92   :  { %1565 = vmatpush1.bf16.msra.mxu0 %v2625_v39  ;;  %v2720_v39 = vld [vmem:[#allocation5 + $0x12c] ss:$16 sps:$4 sm:$0xff]  }
  0x93   :  { %1606 = vmatpush1.bf16.msra.mxu1 %v2628_v40  ;;  %1566 = vmatprep.subr.bf16.mxu0 %v2633_v41  ;;  %v2723_v40 = vld [vmem:[#allocation5 + $0x22c] ss:$16 sps:$4 sm:$0xff]   ;;  %v2718_v41 = vld [vmem:[#allocation5 + $0x128] ss:$16 sps:$4 sm:$0xff]  }
  0x94   :  { %1632 = vmatprep.subr.bf16.mxu1 %v2637_v42  ;;  %v2721_v42 = vld [vmem:[#allocation5 + $0x228] ss:$16 sps:$4 sm:$0xff]  }
  0x96   :  { %1624 = vmatmul.mubr.bf16.vlgmr.msra.gmra.mxu1 %v3038_v44  ;;  %1567 = vmatpush2.bf16.msra.mxu0 %v2631_v43  ;;  %v2726_v43 = vld [vmem:[#allocation5 + $0x10c] ss:$16 sps:$4 sm:$0xff]  }
  0x97   :  { %1633 = vmatpush1.bf16.msra.mxu1 %v2635_v45  ;;  %1568 = vmatprep.subr.bf16.mxu0 %v2640_v46  ;;  %v2729_v45 = vld [vmem:[#allocation5 + $0x20c] ss:$16 sps:$4 sm:$0xff]   ;;  %v2724_v46 = vld [vmem:[#allocation5 + $0x108] ss:$16 sps:$4 sm:$0xff]  }
  0x98   :  { %1634 = vmatprep.subr.bf16.mxu1 %v2643_v48  ;;  %1664 = vmatprep.mubr.bf16.mxu1 %v3018_v47  ;;  %v2659_v47 = vld [vmem:[#allocation5 + $0x68] ss:$16 sps:$4 sm:$0xff]  }
  0x99   :  { %v2727_v48 = vld [vmem:[#allocation5 + $0x208] ss:$16 sps:$4 sm:$0xff]  }
  0x9a   :  { %1569 = vmatpush2.bf16.msra.mxu0 %v2638_v49  ;;  %v2732_v49 = vld [vmem:[#allocation5 + $0x3ec] ss:$16 sps:$4 sm:$0xff]  }
  0x9b   :  { %1635 = vmatpush1.bf16.msra.mxu1 %v2641_v50  ;;  %1570 = vmatprep.subr.bf16.mxu0 %v2646_v52  ;;  %v2735_v50 = vld [vmem:[#allocation5 + $0x4ec] ss:$16 sps:$4 sm:$0xff]   ;;  %v2730_v52 = vld [vmem:[#allocation5 + $0x3e8] ss:$16 sps:$4 sm:$0xff]  }
  0x9c   :  { %1636 = vmatprep.subr.bf16.mxu1 %v2649_v53  ;;  %v2733_v53 = vld [vmem:[#allocation5 + $0x4e8] ss:$16 sps:$4 sm:$0xff]  }
  0x9e   :  { %1571 = vmatpush2.bf16.msra.mxu0 %v2644_v54  ;;  %v2738_v54 = vld [vmem:[#allocation5 + $0x3cc] ss:$16 sps:$4 sm:$0xff]  }
  0x9f   :  { %1637 = vmatpush1.bf16.msra.mxu1 %v2647_v55  ;;  %1572 = vmatprep.subr.bf16.mxu0 %v2652_v56  ;;  %v2741_v55 = vld [vmem:[#allocation5 + $0x4cc] ss:$16 sps:$4 sm:$0xff]   ;;  %v2736_v56 = vld [vmem:[#allocation5 + $0x3c8] ss:$16 sps:$4 sm:$0xff]  }
  0xa0   :  { %1638 = vmatprep.subr.bf16.mxu1 %v2655_v57  ;;  %v2739_v57 = vld [vmem:[#allocation5 + $0x4c8] ss:$16 sps:$4 sm:$0xff]  }
  0xa2   :  { %1573 = vmatpush2.bf16.msra.mxu0 %v2650_v58  ;;  %v2744_v58 = vld [vmem:[#allocation5 + $0x3ac] ss:$16 sps:$4 sm:$0xff]  }
  0xa3   :  { %1639 = vmatpush1.bf16.msra.mxu1 %v2653_v59  ;;  %1574 = vmatprep.subr.bf16.mxu0 %v2658_v60  ;;  %v2747_v59 = vld [vmem:[#allocation5 + $0x4ac] ss:$16 sps:$4 sm:$0xff]   ;;  %v2742_v60 = vld [vmem:[#allocation5 + $0x3a8] ss:$16 sps:$4 sm:$0xff]  }
  0xa4   :  { %1640 = vmatprep.subr.bf16.mxu1 %v2661_v61  ;;  %v2745_v61 = vld [vmem:[#allocation5 + $0x4a8] ss:$16 sps:$4 sm:$0xff]  }
  0xa6   :  { %1575 = vmatpush2.bf16.msra.mxu0 %v2656_v62  ;;  %v2750_v62 = vld [vmem:[#allocation5 + $0x38c] ss:$16 sps:$4 sm:$0xff]  }
  0xa7   :  { %1641 = vmatpush1.bf16.msra.mxu1 %v2659_v47  ;;  %1576 = vmatprep.subr.bf16.mxu0 %v2664_v63  ;;  %v2753_v47 = vld [vmem:[#allocation5 + $0x48c] ss:$16 sps:$4 sm:$0xff]   ;;  %v2748_v63 = vld [vmem:[#allocation5 + $0x388] ss:$16 sps:$4 sm:$0xff]  }
  0xa8   :  { %1642 = vmatprep.subr.bf16.mxu1 %v2667_v0  ;;  %v2751_v0 = vld [vmem:[#allocation5 + $0x488] ss:$16 sps:$4 sm:$0xff]  }
  0xaa   :  { %1577 = vmatpush2.bf16.msra.mxu0 %v2662_v1  ;;  %v2756_v1 = vld [vmem:[#allocation5 + $0x36c] ss:$16 sps:$4 sm:$0xff]  }
  0xab   :  { %1643 = vmatpush1.bf16.msra.mxu1 %v2665_v2  ;;  %1578 = vmatprep.subr.bf16.mxu0 %v2670_v3  ;;  %v2754_v2 = vld [vmem:[#allocation5 + $0x368] ss:$16 sps:$4 sm:$0xff]  }
  0xac   :  { %1644 = vmatprep.subr.bf16.mxu1 %v2673_v4  ;;  %v2757_v3 = vld [vmem:[#allocation5 + $0x468] ss:$16 sps:$4 sm:$0xff]   ;;  %v2765_v4 = vld [vmem:[#allocation5 + $0x44c] ss:$16 sps:$4 sm:$0xff]  }
  0xae   :  { %1579 = vmatpush2.bf16.msra.mxu0 %v2668_v5  ;;  %v2760_v5 = vld [vmem:[#allocation5 + $0x348] ss:$16 sps:$4 sm:$0xff]  }
  0xaf   :  { %1645 = vmatpush1.bf16.msra.mxu1 %v2671_v8  ;;  %1580 = vmatprep.subr.bf16.mxu0 %v2676_v9  ;;  %v2763_v8 = vld [vmem:[#allocation5 + $0x448] ss:$16 sps:$4 sm:$0xff]   ;;  %v2768_v9 = vld [vmem:[#allocation5 + $0x32c] ss:$16 sps:$4 sm:$0xff]  }
  0xb0   :  { %1646 = vmatprep.subr.bf16.mxu1 %v2679_v10  ;;  %v2771_v10 = vld [vmem:[#allocation5 + $0x42c] ss:$16 sps:$4 sm:$0xff]  }
  0xb2   :  { %1581 = vmatpush2.bf16.msra.mxu0 %v2674_v11  ;;  %v2766_v11 = vld [vmem:[#allocation5 + $0x328] ss:$16 sps:$4 sm:$0xff]  }
  0xb3   :  { %1647 = vmatpush1.bf16.msra.mxu1 %v2677_v12  ;;  %1673 = vmatprep.subr.bf16.mxu0 %v2687_v14  ;;  %v2769_v12 = vld [vmem:[#allocation5 + $0x428] ss:$16 sps:$4 sm:$0xff]   ;;  %v2777_v14 = vld [vmem:[#allocation5 + $0x40c] ss:$16 sps:$4 sm:$0xff]  }
  0xb4   :  { %1648 = vmatprep.subr.bf16.mxu1 %v2684_v13  ;;  %v2774_v13 = vld [vmem:[#allocation5 + $0x30c] ss:$16 sps:$4 sm:$0xff]  }
  0xb5   :  { %1583 = vmatmul.mubr.bf16.vlgmr.msra.gmra.mxu0 %v3044_v15 }
  0xb6   :  { %1674 = vmatpush1.bf16.msra.mxu0 %v2685_v18  ;;  %1705 = vmatprep.mubr.bf16.mxu0 %v3020_v51  ;;  %v2709_v51 = vld [vmem:[#allocation5 + $0x268] ss:$16 sps:$4 sm:$0xff]  }
  0xb7   :  { %1649 = vmatpush2.bf16.msra.mxu1 %v2682_v17  ;;  %1675 = vmatprep.subr.bf16.mxu0 %v2693_v20  ;;  %v2772_v17 = vld [vmem:[#allocation5 + $0x308] ss:$16 sps:$4 sm:$0xff]   ;;  %v2783_v20 = vld [vmem:[#allocation5 + $0x6ec] ss:$16 sps:$4 sm:$0xff]  }
  0xb8   :  { %1650 = vmatprep.subr.bf16.mxu1 %v2690_v19  ;;  %v2775_v18 = vld [vmem:[#allocation5 + $0x408] ss:$16 sps:$4 sm:$0xff]   ;;  %v2780_v19 = vld [vmem:[#allocation5 + $0x5ec] ss:$16 sps:$4 sm:$0xff]  }
  0xba   :  { %1676 = vmatpush1.bf16.msra.mxu0 %v2691_v22  ;;  %v2781_v22 = vld [vmem:[#allocation5 + $0x6e8] ss:$16 sps:$4 sm:$0xff]  }
  0xbb   :  { %1651 = vmatpush2.bf16.msra.mxu1 %v2688_v21  ;;  %1677 = vmatprep.subr.bf16.mxu0 %v2699_v24  ;;  %v2778_v21 = vld [vmem:[#allocation5 + $0x5e8] ss:$16 sps:$4 sm:$0xff]   ;;  %v2789_v24 = vld [vmem:[#allocation5 + $0x6cc] ss:$16 sps:$4 sm:$0xff]  }
  0xbc   :  { %1652 = vmatprep.subr.bf16.mxu1 %v2696_v23  ;;  %v2786_v23 = vld [vmem:[#allocation5 + $0x5cc] ss:$16 sps:$4 sm:$0xff]  }
  0xbe   :  { %1678 = vmatpush1.bf16.msra.mxu0 %v2697_v26  ;;  %v2787_v26 = vld [vmem:[#allocation5 + $0x6c8] ss:$16 sps:$4 sm:$0xff]  }
  0xbf   :  { %1653 = vmatpush2.bf16.msra.mxu1 %v2694_v25  ;;  %1679 = vmatprep.subr.bf16.mxu0 %v2705_v28  ;;  %v2784_v25 = vld [vmem:[#allocation5 + $0x5c8] ss:$16 sps:$4 sm:$0xff]   ;;  %v2795_v28 = vld [vmem:[#allocation5 + $0x6ac] ss:$16 sps:$4 sm:$0xff]  }
  0xc0   :  { %1654 = vmatprep.subr.bf16.mxu1 %v2702_v27  ;;  %v2792_v27 = vld [vmem:[#allocation5 + $0x5ac] ss:$16 sps:$4 sm:$0xff]  }
  0xc2   :  { %1680 = vmatpush1.bf16.msra.mxu0 %v2703_v30  ;;  %v2793_v30 = vld [vmem:[#allocation5 + $0x6a8] ss:$16 sps:$4 sm:$0xff]  }
  0xc3   :  { %1655 = vmatpush2.bf16.msra.mxu1 %v2700_v29  ;;  %1681 = vmatprep.subr.bf16.mxu0 %v2711_v32  ;;  %v2790_v29 = vld [vmem:[#allocation5 + $0x5a8] ss:$16 sps:$4 sm:$0xff]   ;;  %v2801_v32 = vld [vmem:[#allocation5 + $0x68c] ss:$16 sps:$4 sm:$0xff]  }
  0xc4   :  { %1656 = vmatprep.subr.bf16.mxu1 %v2708_v31  ;;  %v2798_v31 = vld [vmem:[#allocation5 + $0x58c] ss:$16 sps:$4 sm:$0xff]  }
  0xc6   :  { %1682 = vmatpush1.bf16.msra.mxu0 %v2709_v51  ;;  %v2804_v51 = vld [vmem:[#allocation5 + $0x56c] ss:$16 sps:$4 sm:$0xff]  }
  0xc7   :  { %1657 = vmatpush2.bf16.msra.mxu1 %v2706_v33  ;;  %1683 = vmatprep.subr.bf16.mxu0 %v2717_v36  ;;  %v2799_v33 = vld [vmem:[#allocation5 + $0x688] ss:$16 sps:$4 sm:$0xff]  }
  0xc8   :  { %1658 = vmatprep.subr.bf16.mxu1 %v2714_v34  ;;  %v2807_v34 = vld [vmem:[#allocation5 + $0x66c] ss:$16 sps:$4 sm:$0xff]   ;;  %v2802_v36 = vld [vmem:[#allocation5 + $0x568] ss:$16 sps:$4 sm:$0xff]  }
  0xca   :  { %1684 = vmatpush1.bf16.msra.mxu0 %v2715_v38  ;;  %v2813_v38 = vld [vmem:[#allocation5 + $0x64c] ss:$16 sps:$4 sm:$0xff]  }
  0xcb   :  { %1659 = vmatpush2.bf16.msra.mxu1 %v2712_v37  ;;  %1685 = vmatprep.subr.bf16.mxu0 %v2723_v40  ;;  %v2810_v37 = vld [vmem:[#allocation5 + $0x54c] ss:$16 sps:$4 sm:$0xff]   ;;  %v2811_v40 = vld [vmem:[#allocation5 + $0x648] ss:$16 sps:$4 sm:$0xff]  }
  0xcc   :  { %1660 = vmatprep.subr.bf16.mxu1 %v2720_v39  ;;  %v2808_v39 = vld [vmem:[#allocation5 + $0x548] ss:$16 sps:$4 sm:$0xff]  }
  0xce   :  { %1686 = vmatpush1.bf16.msra.mxu0 %v2721_v42  ;;  %v2819_v42 = vld [vmem:[#allocation5 + $0x62c] ss:$16 sps:$4 sm:$0xff]  }
  0xcf   :  { %1661 = vmatpush2.bf16.msra.mxu1 %v2718_v41  ;;  %1687 = vmatprep.subr.bf16.mxu0 %v2729_v45  ;;  %v2816_v41 = vld [vmem:[#allocation5 + $0x52c] ss:$16 sps:$4 sm:$0xff]   ;;  %v2817_v45 = vld [vmem:[#allocation5 + $0x628] ss:$16 sps:$4 sm:$0xff]  }
  0xd0   :  { %1662 = vmatprep.subr.bf16.mxu1 %v2726_v43  ;;  %v2814_v43 = vld [vmem:[#allocation5 + $0x528] ss:$16 sps:$4 sm:$0xff]  }
  0xd2   :  { %1688 = vmatpush1.bf16.msra.mxu0 %v2727_v48  ;;  %v2825_v48 = vld [vmem:[#allocation5 + $0x60c] ss:$16 sps:$4 sm:$0xff]  }
  0xd3   :  { %1663 = vmatpush2.bf16.msra.mxu1 %v2724_v46  ;;  %1689 = vmatprep.subr.bf16.mxu0 %v2732_v49  ;;  %v2822_v46 = vld [vmem:[#allocation5 + $0x50c] ss:$16 sps:$4 sm:$0xff]   ;;  %v2820_v49 = vld [vmem:[#allocation5 + $0x508] ss:$16 sps:$4 sm:$0xff]  }
  0xd4   :  { %1714 = vmatprep.subr.bf16.mxu1 %v2735_v50  ;;  %v2823_v50 = vld [vmem:[#allocation5 + $0x608] ss:$16 sps:$4 sm:$0xff]  }
  0xd6   :  { %1665 = vmatmul.mubr.bf16.vlgmr.msra.gmra.mxu1 %v3024_v6  ;;  %1690 = vmatpush2.bf16.msra.mxu0 %v2730_v52  ;;  %v2759_v6 = vld [vmem:[#allocation5 + $0x46c] ss:$16 sps:$4 sm:$0xff]  }
  0xd7   :  { %1715 = vmatpush1.bf16.msra.mxu1 %v2733_v53  ;;  %1691 = vmatprep.subr.bf16.mxu0 %v2738_v54  ;;  %v2826_v52 = vld [vmem:[#allocation8 + $0x78] sm:$0xff]   ;;  %v2828_v54 = vld [vmem:[#allocation8 + $0x70] sm:$0xff]  }
  0xd8   :  { %1716 = vmatprep.subr.bf16.mxu1 %v2741_v55  ;;  %1746 = vmatprep.mubr.bf16.mxu1 %v3035_v35  ;;  %v2762_v35 = vld [vmem:[#allocation5 + $0x34c] ss:$16 sps:$4 sm:$0xff]   ;;  %v2829_v55 = vld [vmem:[#allocation8 + $0x30] sm:$0xff]  }
  0xd9   :  { %v2827_v53 = vld [vmem:[#allocation8 + $0x38] sm:$0xff]  }
  0xda   :  { %1692 = vmatpush2.bf16.msra.mxu0 %v2736_v56  ;;  %v2830_v56 = vld [vmem:[#allocation8 + $0x68] sm:$0xff]  }
  0xdb   :  { %1717 = vmatpush1.bf16.msra.mxu1 %v2739_v57  ;;  %1693 = vmatprep.subr.bf16.mxu0 %v2744_v58  ;;  %v2831_v57 = vld [vmem:[#allocation8 + $0x28] sm:$0xff]   ;;  %v2832_v58 = vld [vmem:[#allocation8 + $0x60] sm:$0xff]  }
  0xdc   :  { %1718 = vmatprep.subr.bf16.mxu1 %v2747_v59  ;;  %v2833_v59 = vld [vmem:[#allocation8 + $0x20] sm:$0xff]  }
  0xde   :  { %1694 = vmatpush2.bf16.msra.mxu0 %v2742_v60  ;;  %v2834_v60 = vld [vmem:[#allocation8 + $0x58] sm:$0xff]  }
  0xdf   :  { %1719 = vmatpush1.bf16.msra.mxu1 %v2745_v61  ;;  %1695 = vmatprep.subr.bf16.mxu0 %v2750_v62  ;;  %v2835_v61 = vld [vmem:[#allocation8 + $0x18] sm:$0xff]   ;;  %v2836_v62 = vld [vmem:[#allocation8 + $0x50] sm:$0xff]  }
  0xe0   :  { %1720 = vmatprep.subr.bf16.mxu1 %v2753_v47  ;;  %v2839_v47 = vld [vmem:[#allocation8 + $0x8] sm:$0xff]  }
  0xe2   :  { %1696 = vmatpush2.bf16.msra.mxu0 %v2748_v63  ;;  %v2840_v63 = vld [vmem:[#allocation8 + $0x40] sm:$0xff]  }
  0xe3   :  { %1721 = vmatpush1.bf16.msra.mxu1 %v2751_v0  ;;  %1697 = vmatprep.subr.bf16.mxu0 %v2756_v1  ;;  %v2841_v0 = vld [vmem:[#allocation8] sm:$0xff]  }
  0xe4   :  { %1722 = vmatprep.subr.bf16.mxu1 %v2759_v6 }
  0xe6   :  { %1698 = vmatpush2.bf16.msra.mxu0 %v2754_v2 }
  0xe7   :  { %1723 = vmatpush1.bf16.msra.mxu1 %v2757_v3  ;;  %1699 = vmatprep.subr.bf16.mxu0 %v2762_v35 }
  0xe8   :  { %1724 = vmatprep.subr.bf16.mxu1 %v2765_v4 }
  0xea   :  { %1700 = vmatpush2.bf16.msra.mxu0 %v2760_v5 }
  0xeb   :  { %1725 = vmatpush1.bf16.msra.mxu1 %v2763_v8  ;;  %1701 = vmatprep.subr.bf16.mxu0 %v2768_v9  ;;  %v2842_v9 = vld [vmem:[#allocation8 + $0xf8] sm:$0xff]  }
  0xec   :  { %1726 = vmatprep.subr.bf16.mxu1 %v2771_v10  ;;  %v2843_v10 = vld [vmem:[#allocation8 + $0xb8] sm:$0xff]  }
  0xee   :  { %1702 = vmatpush2.bf16.msra.mxu0 %v2766_v11  ;;  %v2844_v11 = vld [vmem:[#allocation8 + $0xf0] sm:$0xff]  }
  0xef   :  { %1727 = vmatpush1.bf16.msra.mxu1 %v2769_v12  ;;  %1703 = vmatprep.subr.bf16.mxu0 %v2774_v13  ;;  %v2845_v12 = vld [vmem:[#allocation8 + $0xb0] sm:$0xff]   ;;  %v2846_v13 = vld [vmem:[#allocation8 + $0xe8] sm:$0xff]  }
  0xf0   :  { %1728 = vmatprep.subr.bf16.mxu1 %v2777_v14  ;;  %v2847_v14 = vld [vmem:[#allocation8 + $0xa8] sm:$0xff]  }
  0xf2   :  { %1704 = vmatpush2.bf16.msra.mxu0 %v2772_v17  ;;  %v2848_v17 = vld [vmem:[#allocation8 + $0xe0] sm:$0xff]  }
  0xf3   :  { %1729 = vmatpush1.bf16.msra.mxu1 %v2775_v18  ;;  %1755 = vmatprep.subr.bf16.mxu0 %v2783_v20  ;;  %v2849_v18 = vld [vmem:[#allocation8 + $0xa0] sm:$0xff]   ;;  %v2851_v20 = vld [vmem:[#allocation8 + $0x98] sm:$0xff]  }
  0xf4   :  { %1730 = vmatprep.subr.bf16.mxu1 %v2780_v19  ;;  %v2850_v19 = vld [vmem:[#allocation8 + $0xd8] sm:$0xff]  }
  0xf5   :  { %1706 = vmatmul.mubr.bf16.vlgmr.msra.gmra.mxu0 %v3026_v7  ;;  %v2796_v7 = vld [vmem:[#allocation5 + $0x588] ss:$16 sps:$4 sm:$0xff]  }
  0xf6   :  { %1756 = vmatpush1.bf16.msra.mxu0 %v2781_v22  ;;  %1787 = vmatprep.mubr.bf16.mxu0 %v2974_v16  ;;  %v2805_v16 = vld [vmem:[#allocation5 + $0x668] ss:$16 sps:$4 sm:$0xff]  }
  0xf7   :  { %1731 = vmatpush2.bf16.msra.mxu1 %v2778_v21  ;;  %1757 = vmatprep.subr.bf16.mxu0 %v2789_v24  ;;  %v2852_v21 = vld [vmem:[#allocation8 + $0xd0] sm:$0xff]  }
  0xf8   :  { %1732 = vmatprep.subr.bf16.mxu1 %v2786_v23  ;;  %v2853_v22 = vld [vmem:[#allocation8 + $0x90] sm:$0xff]  }
  0xfa   :  { %1758 = vmatpush1.bf16.msra.mxu0 %v2787_v26  ;;  %v2855_v26 = vld [vmem:[#allocation8 + $0x88] sm:$0xff]  }
  0xfb   :  { %1733 = vmatpush2.bf16.msra.mxu1 %v2784_v25  ;;  %1759 = vmatprep.subr.bf16.mxu0 %v2795_v28  ;;  %v2854_v25 = vld [vmem:[#allocation8 + $0xc8] sm:$0xff]  }
  0xfc   :  { %1734 = vmatprep.subr.bf16.mxu1 %v2792_v27 }
  0xfe   :  { %1760 = vmatpush1.bf16.msra.mxu0 %v2793_v30  ;;  %v2857_v30 = vld [vmem:[#allocation8 + $0x80] sm:$0xff]  }
  0xff   :  { %1735 = vmatpush2.bf16.msra.mxu1 %v2790_v29  ;;  %1761 = vmatprep.subr.bf16.mxu0 %v2801_v32  ;;  %v2856_v29 = vld [vmem:[#allocation8 + $0xc0] sm:$0xff]  }
 0x100   :  { %1736 = vmatprep.subr.bf16.mxu1 %v2798_v31  ;;  %v303_v31 = vlaneseq }
 0x102   :  { %1762 = vmatpush1.bf16.msra.mxu0 %v2799_v33  ;;  %v304_v32 = vshrl.u32 %v303_v31, 7  ;;  %v301_v33 = vld [vmem:[#allocation7] sm:$0xf] }
 0x103   :  { %1737 = vmatpush2.bf16.msra.mxu1 %v2796_v7  ;;  %1763 = vmatprep.subr.bf16.mxu0 %v2807_v34 }
 0x104   :  { %1738 = vmatprep.subr.bf16.mxu1 %v2804_v51  ;;  %v305_v7 = vsub.s32 0, %v304_v32  ;;  %v309_v51 = vsub.s32 1, %v304_v32 }
 0x106   :  { %1764 = vmatpush1.bf16.msra.mxu0 %v2805_v16  ;;  %v306_v34 = vrot.slane %v301_v33, %v305_v7 }
 0x107   :  { %1739 = vmatpush2.bf16.msra.mxu1 %v2802_v36  ;;  %1765 = vmatprep.subr.bf16.mxu0 %v2813_v38  ;;  %v310_v36 = vrot.slane %v301_v33, %v309_v51 }
 0x108   :  { %1740 = vmatprep.subr.bf16.mxu1 %v2810_v37 }
 0x10a   :  { %1766 = vmatpush1.bf16.msra.mxu0 %v2811_v40 }
 0x10b   :  { %1741 = vmatpush2.bf16.msra.mxu1 %v2808_v39  ;;  %1767 = vmatprep.subr.bf16.mxu0 %v2819_v42 }
 0x10c   :  { %1742 = vmatprep.subr.bf16.mxu1 %v2816_v41 }
 0x10e   :  { %1768 = vmatpush1.bf16.msra.mxu0 %v2817_v45 }
 0x10f   :  { %1743 = vmatpush2.bf16.msra.mxu1 %v2814_v43  ;;  %1769 = vmatprep.subr.bf16.mxu0 %v2825_v48 }
 0x110   :  { %1744 = vmatprep.subr.bf16.mxu1 %v2822_v46 }
 0x112   :  { %1770 = vmatpush1.bf16.msra.mxu0 %v2823_v50 }
 0x113   :  { %1745 = vmatpush2.bf16.msra.mxu1 %v2820_v49  ;;  %2429 = vmatprep.subr.bf16.mxu0 %v2826_v52 }
 0x114   :  { %2451 = vmatprep.subr.bf16.mxu1 %v2842_v9 }
 0x115   :  { %1788 = vmatmul.mubr.bf16.vlgmr.msra.gmra.mxu0 %v3038_v44  ;;  %v2838_v44 = vld [vmem:[#allocation8 + $0x48] sm:$0xff]  }
 0x116   :  { %1747 = vmatmul.mubr.bf16.vlgmr.msra.gmra.mxu1 %v3044_v15  ;;  %2430 = vmatpush3.bf16.msra.mxu0 %v2827_v53  ;;  %v2837_v15 = vld [vmem:[#allocation8 + $0x10] sm:$0xff]  }
 0x117   :  { %2431 = vmatprep.subr.bf16.mxu0 %v2828_v54  ;;  %2452 = vmatpush3.bf16.msra.mxu1 %v2843_v10 }
 0x118   :  { %2453 = vmatprep.subr.bf16.mxu1 %v2844_v11 }
 0x11a   :  { %2432 = vmatpush3.bf16.msra.mxu0 %v2829_v55 }
 0x11b   :  { %2433 = vmatprep.subr.bf16.mxu0 %v2830_v56  ;;  %2454 = vmatpush3.bf16.msra.mxu1 %v2845_v12 }
 0x11c   :  { %2455 = vmatprep.subr.bf16.mxu1 %v2846_v13 }
 0x11e   :  { %2434 = vmatpush3.bf16.msra.mxu0 %v2831_v57 }
 0x11f   :  { %2435 = vmatprep.subr.bf16.mxu0 %v2832_v58  ;;  %2456 = vmatpush3.bf16.msra.mxu1 %v2847_v14 }
 0x120   :  { %2457 = vmatprep.subr.bf16.mxu1 %v2848_v17 }
 0x122   :  { %2436 = vmatpush3.bf16.msra.mxu0 %v2833_v59 }
 0x123   :  { %2437 = vmatprep.subr.bf16.mxu0 %v2834_v60  ;;  %2458 = vmatpush3.bf16.msra.mxu1 %v2849_v18 }
 0x124   :  { %2459 = vmatprep.subr.bf16.mxu1 %v2850_v19 }
 0x126   :  { %2438 = vmatpush3.bf16.msra.mxu0 %v2835_v61 }
 0x127   :  { %2439 = vmatprep.subr.bf16.mxu0 %v2836_v62  ;;  %2460 = vmatpush3.bf16.msra.mxu1 %v2851_v20 }
 0x128   :  { %2461 = vmatprep.subr.bf16.mxu1 %v2852_v21 }
 0x12a   :  { %2440 = vmatpush3.bf16.msra.mxu0 %v2837_v15  ;;  %v313_v15 = vsub.s32 2, %v304_v32 }
 0x12b   :  { %2441 = vmatprep.subr.bf16.mxu0 %v2838_v44  ;;  %2462 = vmatpush3.bf16.msra.mxu1 %v2853_v22  ;;  %v317_v44 = vsub.s32 3, %v304_v32 }
 0x12c   :  { %2463 = vmatprep.subr.bf16.mxu1 %v2854_v25 }
 0x12e   :  { %2442 = vmatpush3.bf16.msra.mxu0 %v2839_v47  ;;  %v314_v47 = vrot.slane %v301_v33, %v313_v15 }
 0x12f   :  { %2443 = vmatprep.subr.bf16.mxu0 %v2840_v63  ;;  %2464 = vmatpush3.bf16.msra.mxu1 %v2855_v26  ;;  %v318_v63 = vrot.slane %v301_v33, %v317_v44 }
 0x130   :  { %2465 = vmatprep.subr.bf16.mxu1 %v2856_v29 }
 0x132   :  { %2444 = vmatpush3.bf16.msra.mxu0 %v2841_v0 }
 0x133   :  { %2466 = vmatpush3.bf16.msra.mxu1 %v2857_v30 }
 0x135   :  { %v1502_v1 = vpop.f32.mrf.mxu0 }
 0x136   :  { %v1543_v6 = vpop.f32.mrf.mxu1  ;;  %v1503_v16 = vadd.f32 %v1502_v1, %v306_v34 }
 0x137   :  { %v1504_v2 = vpop.f32.mrf.mxu0 }
 0x138   :  { %v1545_v3 = vpop.f32.mrf.mxu1  ;;  %v1505_v37 = vadd.f32 %v1504_v2, %v310_v36  ;;  %v1544_v38 = vadd.f32 %v1543_v6, %v1503_v16 }
 0x139   :  { %v1506_v35 = vpop.f32.mrf.mxu0 }
 0x13a   :  { %v1547_v4 = vpop.f32.mrf.mxu1  ;;  %v1546_v40 = vadd.f32 %v1545_v3, %v1505_v37 }
 0x13b   :  { %v1507_v5 = vpop.f32.mrf.mxu0 }
 0x13c   :  { %v1548_v8 = vpop.f32.mrf.mxu1 }
 0x156   :  { %v1625_v23 = vpop.f32.mrf.mxu1 }
 0x158   :  { %v1627_v24 = vpop.f32.mrf.mxu1 }
 0x15a   :  { %v1629_v27 = vpop.f32.mrf.mxu1 }
 0x15b   :  { %v2396_v27 = vld [vmem:[%s3064_s4] ss:$0 sm:$0xff] }
 0x15c   :  { %v1630_v28 = vpop.f32.mrf.mxu1 }
 0x175   :  { %v1584_v39 = vpop.f32.mrf.mxu0 }
 0x176   :  { %v1585_v41 = vadd.f32 %v1584_v39, %v1544_v38 }
 0x177   :  { %v1586_v42 = vpop.f32.mrf.mxu0 }
 0x178   :  { %v1626_v43 = vadd.f32 %v1625_v23, %v1585_v41  ;;  %v1587_v45 = vadd.f32 %v1586_v42, %v1546_v40 }
 0x179   :  { %v1588_v46 = vpop.f32.mrf.mxu0 }
 0x17a   :  { %v1628_v48 = vadd.f32 %v1627_v24, %v1587_v45  ;;  %v1796_v49 = vmax.f32 %v1626_v43, 0.0 }
 0x17b   :  { %v1589_v50 = vpop.f32.mrf.mxu0 }
 0x17c   :  { %v1797_v52 = vmax.f32 %v1628_v48, 0.0  ;;  %v1800_v54 = vpack.c.bf16 %v1796_v49, %v1796_v49 }
 0x17e   :  { %v1801_v53 = vpack.c.bf16 %v1797_v52, %v1797_v52 }
 0x180   :  { %2099 = vmatprep.mubr.bf16.mxu0 %v1801_v53 }
 0x181   :  { %2100 = vmatmul.mubr.bf16.vlgmr.msra.gmra.mxu0 %v1800_v54 }
 0x196   :  { %v1666_v55 = vpop.f32.mrf.mxu1 }
 0x197   :  { %v1667_v0 = vadd.f32 %v1666_v55, %v314_v47 }
 0x198   :  { %v1668_v56 = vpop.f32.mrf.mxu1 }
 0x199   :  { %v1669_v1 = vadd.f32 %v1668_v56, %v318_v63 }
 0x19a   :  { %v1670_v57 = vpop.f32.mrf.mxu1 }
 0x19c   :  { %v1671_v58 = vpop.f32.mrf.mxu1 }
 0x1b5   :  { %v1707_v59 = vpop.f32.mrf.mxu0 }
 0x1b6   :  { %v1708_v6 = vadd.f32 %v1707_v59, %v1667_v0 }
 0x1b7   :  { %v1709_v60 = vpop.f32.mrf.mxu0 }
 0x1b8   :  { %v1710_v35 = vadd.f32 %v1709_v60, %v1669_v1 }
 0x1b9   :  { %v1711_v61 = vpop.f32.mrf.mxu0 }
 0x1bb   :  { %v1712_v62 = vpop.f32.mrf.mxu0 }
 0x1d5   :  { %v1789_v3 = vpop.f32.mrf.mxu0 }
 0x1d6   :  { %v1748_v2 = vpop.f32.mrf.mxu1 }
 0x1d7   :  { %v1749_v4 = vadd.f32 %v1748_v2, %v1708_v6  ;;  %v1791_v8 = vpop.f32.mrf.mxu0 }
 0x1d8   :  { %v1750_v5 = vpop.f32.mrf.mxu1 }
 0x1d9   :  { %v1790_v9 = vadd.f32 %v1789_v3, %v1749_v4  ;;  %v1751_v10 = vadd.f32 %v1750_v5, %v1710_v35  ;;  %v1793_v12 = vpop.f32.mrf.mxu0 }
 0x1da   :  { %v1752_v11 = vpop.f32.mrf.mxu1 }
 0x1db   :  { %v1792_v13 = vadd.f32 %v1791_v8, %v1751_v10  ;;  %v1798_v14 = vmax.f32 %v1790_v9, 0.0  ;;  %v1794_v18 = vpop.f32.mrf.mxu0 }
 0x1dc   :  { %v1753_v17 = vpop.f32.mrf.mxu1 }
 0x1dd   :  { %v1799_v19 = vmax.f32 %v1792_v13, 0.0  ;;  %v1802_v21 = vpack.c.bf16 %v1798_v14, %v1798_v14 }
 0x1df   :  { %v1803_v20 = vpack.c.bf16 %v1799_v19, %v1799_v19 }
 0x1e1   :  { %2139 = vmatprep.mubr.bf16.mxu1 %v1803_v20 }
 0x1e2   :  { %2140 = vmatmul.mubr.bf16.vlgmr.msra.gmra.mxu1 %v1802_v21 }
 0x241   :  { %v2445_v22 = vpop.f32.mrf.mxu0 }
 0x243   :  { %v2446_v23 = vpop.f32.mrf.mxu0 }
 0x244   :  { %v2447_v24 = vadd.f32 %v2446_v23, %v2445_v22 }
 0x245   :  { %v2448_v25 = vpop.f32.mrf.mxu0 }
 0x246   :  { %v2102_v30 = vadd.f32 %v2447_v24, %v2396_v27 }
 0x247   :  { %v2449_v26 = vpop.f32.mrf.mxu0 }
 0x2a2   :  { %v2467_v28 = vpop.f32.mrf.mxu1 }
 0x2a4   :  { %v2468_v29 = vpop.f32.mrf.mxu1 }
 0x2a5   :  { %v2469_v31 = vadd.f32 %v2468_v29, %v2467_v28 }
 0x2a6   :  { %v2470_v32 = vpop.f32.mrf.mxu1 }
 0x2a7   :  { %v2142_v7 = vadd.f32 %v2469_v31, %v2102_v30 }
 0x2a8   :  { %v2471_v33 = vpop.f32.mrf.mxu1 }
 0x2a9   :  { %2147 = vst [vmem:[#allocation10] sm:$0xff] %v2142_v7 }
 0x2aa   :  { %2949 = shalt.err (!%p2946_p10)
}
 0x2ab   :  { %2157 = dma.vmem_to_hbm [thread:$0]  %s2155_s16, 128, %s3065_s5, [#allocation4]  }
 0x2ac   :  { %2964 = dma.done.wait [#allocation4], 128  }
 0x2ad   :  { %2965 = vsyncadd [#allocation4], 4294967168 }
 0x2ae   :  { %2161 = vsyncpa [#allocation3], 1 }
 0x2af   :  { %2162 = vsyncpa [#allocation6], 1 }
 0x2b0   :  { %2163 = vsyncpa [#allocation9], 1 }
 0x2b1   :  { %2164 = vsyncpa [#allocation4], 1 }

</bundles_post_ra>
